<compile_context>
chip_gen: v5e
topology: v5e:2x2
jax: 0.10.0
libtpu: 0.0.40
codegen_flags: <defaults>
</compile_context>

<pallas_src>
import math

import jax
import jax.numpy as jnp
from jax.experimental import pallas as pl
from jax.experimental.pallas import tpu as pltpu


HEAD_LANES = 128        # lane-dense head: lane 0 = value, lanes 1..A = advantage
FUSED_MAX_BATCH = 1024  # up to this B we run the single-tile, fully fused kernel


def _is_v5e():
    """v5e's MXU is 128x128-native -> split the block-diag layer-2 matmul there."""
    try:
        kind = jax.devices()[0].device_kind.lower()
    except Exception:
        return False
    return ("v5e" in kind) or ("v5 lite" in kind) or ("v5lite" in kind)


# ---------------------------------------------------------------------------
# Kernels
# ---------------------------------------------------------------------------

def _trunk(x_ref, w1_ref, w2_ref, w4_ref, b_ref, *, hid1, hid2, split_l2):
    """Shared 3-matmul trunk.  Returns the packed f32 head (TB, 128):
    lane 0 = value, lanes 1..A = advantage, remaining lanes 0."""
    f32 = jnp.float32
    # In-kernel cast: x arrives in its native dtype; the bf16 cast is free VPU
    # work here and avoids a separate XLA astype pass over x in HBM.
    x = x_ref[...].astype(jnp.bfloat16)

    b1 = b_ref[0:1, 0:2 * hid1]
    b4 = b_ref[2:3, 0:HEAD_LANES]

    h1 = jnp.dot(x, w1_ref[...], preferred_element_type=f32) + b1
    h1 = jnp.maximum(h1, 0.0).astype(jnp.bfloat16)                     # (TB, 2*H1)

    if split_l2:
        # v5e path: w2_ref is [w2v; w2a] stacked along rows -> two 128x128 dots
        # (2 MXU passes) instead of a zero-padded 256x256 block-diag (4 passes).
        h2v = (jnp.dot(h1[:, :hid1], w2_ref[:hid1, :], preferred_element_type=f32)
               + b_ref[1:2, 0:hid2])
        h2a = (jnp.dot(h1[:, hid1:2 * hid1], w2_ref[hid1:, :], preferred_element_type=f32)
               + b_ref[1:2, hid2:2 * hid2])
        h2v = jnp.maximum(h2v, 0.0).astype(jnp.bfloat16)
        h2a = jnp.maximum(h2a, 0.0).astype(jnp.bfloat16)
        head = (jnp.dot(h2v, w4_ref[:hid2, :], preferred_element_type=f32)
                + jnp.dot(h2a, w4_ref[hid2:, :], preferred_element_type=f32)
                + b4)
    else:
        # v6e/v7x path: the 256x256 block-diag exactly fills one MXU pass.
        b2 = b_ref[1:2, 0:2 * hid2]
        h2 = jnp.dot(h1, w2_ref[...], preferred_element_type=f32) + b2
        h2 = jnp.maximum(h2, 0.0).astype(jnp.bfloat16)                 # (TB, 2*H2)
        head = jnp.dot(h2, w4_ref[...], preferred_element_type=f32) + b4
    return head


def _make_fused_kernel(action_size, batch, hid1, hid2, split_l2):
    """Single-tile kernel: dueling combine (GLOBAL adv mean) fused in-kernel."""
    inv_count = 1.0 / float(batch * action_size)

    def kernel(x_ref, w1_ref, w2_ref, w4_ref, b_ref, q_ref):
        head = _trunk(x_ref, w1_ref, w2_ref, w4_ref, b_ref,
                      hid1=hid1, hid2=hid2, split_l2=split_l2)
        # Global mean over all advantages (torch: adv.mean(), no dim argument).
        lane = jax.lax.broadcasted_iota(jnp.int32, head.shape, 1)
        adv_mask = (lane >= 1) & (lane <= action_size)
        adv_mean = jnp.sum(jnp.where(adv_mask, head, 0.0)) * inv_count
        # lanes 1..A now hold val + adv - mean; lane-dense bf16 store.
        q = head + head[:, 0:1] - adv_mean
        q_ref[...] = q.astype(q_ref.dtype)

    return kernel


def _make_tiled_kernel(hid1, hid2, split_l2):
    """Batch-tiled kernel: emits the packed bf16 head; combine done in epilogue."""

    def kernel(x_ref, w1_ref, w2_ref, w4_ref, b_ref, head_ref):
        head = _trunk(x_ref, w1_ref, w2_ref, w4_ref, b_ref,
                      hid1=hid1, hid2=hid2, split_l2=split_l2)
        head_ref[...] = head.astype(head_ref.dtype)   # bf16: halves head writeback

    return kernel


# ---------------------------------------------------------------------------
# Parameter packing & forward wrapper
# ---------------------------------------------------------------------------

def pack_params(p, action_size, hid1=128, hid2=128, split_l2=None):
    """Pack the 12 PyTorch-style tensors into 4 fused slabs (done once)."""
    assert 1 <= action_size <= HEAD_LANES - 1, \
        "lane-dense head packing supports at most 127 actions"
    if split_l2 is None:
        split_l2 = _is_v5e()

    f32, bf16 = jnp.float32, jnp.bfloat16

    # layer 1: shared input -> column-concat
    w1 = jnp.concatenate([p["w1v"], p["w1a"]], axis=1).astype(bf16)          # (S, 2*H1)

    # layer 2: block-diag (v6e/v7x) or row-stacked for two separate dots (v5e)
    if split_l2:
        w2 = jnp.concatenate([p["w2v"], p["w2a"]], axis=0).astype(bf16)      # (2*H1, H2)
    else:
        w2 = jnp.zeros((2 * hid1, 2 * hid2), f32)
        w2 = w2.at[:hid1, :hid2].set(p["w2v"]).at[hid1:, hid2:].set(p["w2a"])
        w2 = w2.astype(bf16)                                                 # (2*H1, 2*H2)

    # heads: value -> lane 0, advantage -> lanes 1..A, zero-padded to 128 lanes
    w4 = jnp.zeros((2 * hid2, HEAD_LANES), f32)
    w4 = w4.at[:hid2, 0:1].set(p["w4v"]).at[hid2:, 1:1 + action_size].set(p["w4a"])
    w4 = w4.astype(bf16)                                                     # (2*H2, 128)

    # all biases in one (8, W) f32 slab; W sized so every row fits
    bias_w = max(2 * hid1, 2 * hid2, HEAD_LANES)
    bias_w = ((bias_w + 127) // 128) * 128
    b = jnp.zeros((8, bias_w), f32)
    b = b.at[0, :hid1].set(p["b1v"][0]).at[0, hid1:2 * hid1].set(p["b1a"][0])
    b = b.at[1, :hid2].set(p["b2v"][0]).at[1, hid2:2 * hid2].set(p["b2a"][0])
    b = b.at[2, 0].set(p["b4v"][0, 0])
    b = b.at[2, 1:1 + action_size].set(p["b4a"][0])

    return dict(w1=w1, w2=w2, w4=w4, b=b,
                action_size=action_size, hid1=hid1, hid2=hid2, split_l2=split_l2)


def dueling_q_forward(x, packed):
    B, S = x.shape
    A = packed["action_size"]
    hid1, hid2 = packed["hid1"], packed["hid2"]
    split_l2 = packed["split_l2"]
    w1, w2, w4, b = packed["w1"], packed["w2"], packed["w4"], packed["b"]

    weight_specs = [
        pl.BlockSpec(w1.shape, lambda i: (0, 0)),   # weights stay VMEM-resident
        pl.BlockSpec(w2.shape, lambda i: (0, 0)),
        pl.BlockSpec(w4.shape, lambda i: (0, 0)),
        pl.BlockSpec(b.shape, lambda i: (0, 0)),
    ]

    if B <= FUSED_MAX_BATCH:
        # Single tile: fuse the dueling combine in-kernel -> the bf16 output already
        # holds q in lanes 1..A; no XLA epilogue pass over the head, one dispatch.
        # (On v7x this forgoes 2-TC grid sharding for 256<=B<=1024; the saved HBM
        # round-trip + launch dominates at these sizes.)
        kernel = _make_fused_kernel(A, B, hid1, hid2, split_l2)
        q = pl.pallas_call(
            kernel,
            out_shape=jax.ShapeDtypeStruct((B, HEAD_LANES), jnp.bfloat16),
            grid_spec=pltpu.PrefetchScalarGridSpec(
                num_scalar_prefetch=0,
                grid=(1,),
                in_specs=[pl.BlockSpec((B, S), lambda i: (0, 0))] + weight_specs,
                out_specs=pl.BlockSpec((B, HEAD_LANES), lambda i: (0, 0)),
            ),
            compiler_params=pltpu.CompilerParams(
                dimension_semantics=("arbitrary",),
            ),
        )(x, w1, w2, w4, b)
        return q[:, 1:1 + A].astype(jnp.float32)

    # Large-batch path: tile the batch (weights resident), emit the packed bf16 head.
    # The module's GLOBAL adv.mean() couples every batch row across tiles, so the
    # tiny O(B*A) combine stays an XLA epilogue.
    if B >= 8192:
        TB = 4096       # v5e note: with its 16 MiB default scoped VMEM prefer 2048
    elif B >= 4096:
        TB = 2048
    else:
        TB = 1024
    kernel = _make_tiled_kernel(hid1, hid2, split_l2)
    head = pl.pallas_call(
        kernel,
        out_shape=jax.ShapeDtypeStruct((B, HEAD_LANES), jnp.bfloat16),
        grid_spec=pltpu.PrefetchScalarGridSpec(
            num_scalar_prefetch=0,
            grid=(pl.cdiv(B, TB),),
            in_specs=[pl.BlockSpec((TB, S), lambda i: (i, 0))] + weight_specs,
            out_specs=pl.BlockSpec((TB, HEAD_LANES), lambda i: (i, 0)),
        ),
        compiler_params=pltpu.CompilerParams(
            dimension_semantics=("parallel",),        # batch tiles shard across v7x's 2 TCs
            vmem_limit_bytes=32 * 1024 * 1024,        # headroom above v5e's 16 MiB default
        ),
    )(x, w1, w2, w4, b)

    val = head[:, 0:1].astype(jnp.float32)
    adv = head[:, 1:1 + A].astype(jnp.float32)
    return val + adv - jnp.mean(adv)


# ---------------------------------------------------------------------------
# Init + references
# ---------------------------------------------------------------------------

def init_params(key, state_size, action_size, hidsize1=128, hidsize2=128):
    """nn.Linear-style init: U(-1/sqrt(fan_in), 1/sqrt(fan_in)).
    Weights stored (in_features, out_features); biases (1, out_features)."""
    def linear(key, fan_in, fan_out):
        kw, kb = jax.random.split(key)
        bound = 1.0 / math.sqrt(fan_in)
        w = jax.random.uniform(kw, (fan_in, fan_out), jnp.float32, -bound, bound)
        b = jax.random.uniform(kb, (1, fan_out), jnp.float32, -bound, bound)
        return w, b

    keys = jax.random.split(key, 6)
    w1v, b1v = linear(keys[0], state_size, hidsize1)
    w2v, b2v = linear(keys[1], hidsize1, hidsize2)
    w4v, b4v = linear(keys[2], hidsize2, 1)
    w1a, b1a = linear(keys[3], state_size, hidsize1)
    w2a, b2a = linear(keys[4], hidsize1, hidsize2)
    w4a, b4a = linear(keys[5], hidsize2, action_size)
    return dict(w1v=w1v, b1v=b1v, w2v=w2v, b2v=b2v, w4v=w4v, b4v=b4v,
                w1a=w1a, b1a=b1a, w2a=w2a, b2a=b2a, w4a=w4a, b4a=b4a)


def reference_forward_f32(x, p):
    """Pure-f32 JAX reference mirroring the PyTorch module (global adv.mean())."""
    val = jax.nn.relu(x @ p["w1v"] + p["b1v"])
    val = jax.nn.relu(val @ p["w2v"] + p["b2v"])
    val = val @ p["w4v"] + p["b4v"]
    adv = jax.nn.relu(x @ p["w1a"] + p["b1a"])
    adv = jax.nn.relu(adv @ p["w2a"] + p["b2a"])
    adv = adv @ p["w4a"] + p["b4a"]
    return val + adv - jnp.mean(adv)


def reference_forward_bf16(x, p):
    """Reference with the same bf16-input / f32-accumulate / bf16-head quantization."""
    bf = lambda a: a.astype(jnp.bfloat16)

    def lin(a, w, b):
        return jnp.dot(bf(a), bf(w), preferred_element_type=jnp.float32) + b

    val = jax.nn.relu(lin(x, p["w1v"], p["b1v"]))
    val = jax.nn.relu(lin(val, p["w2v"], p["b2v"]))
    val = lin(val, p["w4v"], p["b4v"])
    adv = jax.nn.relu(lin(x, p["w1a"], p["b1a"]))
    adv = jax.nn.relu(lin(adv, p["w2a"], p["b2a"]))
    adv = lin(adv, p["w4a"], p["b4a"])
    val = val.astype(jnp.bfloat16).astype(jnp.float32)
    adv = adv.astype(jnp.bfloat16).astype(jnp.float32)
    return val + adv - jnp.mean(adv)


if __name__ == "__main__":
    state_size = 32
    action_size = 4

    key = jax.random.PRNGKey(0)
    k_params, k_x1, k_x2 = jax.random.split(key, 3)

    params = init_params(k_params, state_size, action_size)
    packed = pack_params(params, action_size)

    # --- small batch: fully-fused single-tile path (combine done in-kernel) ---
    batch = 2
    x = jax.random.normal(k_x1, (batch, state_size), jnp.float32)
    out = jax.block_until_ready(dueling_q_forward(x, packed))
    assert out.shape == (batch, action_size)

    ref_bf16 = reference_forward_bf16(x, params)
    assert jnp.allclose(out, ref_bf16, atol=3e-2, rtol=3e-2), (out, ref_bf16)
    ref_f32 = reference_forward_f32(x, params)
    assert jnp.allclose(out, ref_f32, atol=0.15, rtol=0.15), (out, ref_f32)

    # --- large batch: tiled path (bf16 head + tiny XLA combine epilogue),
    #     non-divisible grid exercises partial batch tiles ---
    big_batch = 2560
    xb = jax.random.normal(k_x2, (big_batch, state_size), jnp.float32)
    out_b = jax.block_until_ready(dueling_q_forward(xb, packed))
    assert out_b.shape == (big_batch, action_size)
    ref_b = reference_forward_bf16(xb, params)
    assert jnp.allclose(out_b, ref_b, atol=3e-2, rtol=3e-2)

    print("KERNEL_OK")
</pallas_src>

<mosaic_0001>
module attributes {stable_mosaic.version = 11 : i64} {
  func.func @kernel(%arg0: i32, %arg1: memref<2x32xf32, #tpu.memory_space<vmem>>, %arg2: memref<32x256xbf16, #tpu.memory_space<vmem>>, %arg3: memref<256x256xbf16, #tpu.memory_space<vmem>>, %arg4: memref<256x128xbf16, #tpu.memory_space<vmem>>, %arg5: memref<8x256xf32, #tpu.memory_space<vmem>>, %arg6: memref<2x128xbf16, #tpu.memory_space<vmem>>) attributes {dimension_semantics = [#tpu.dimension_semantics<arbitrary>], iteration_bounds = array<i64: 1>, scalar_prefetch = 0 : i64, scratch_operands = 0 : i64, tpu.core_type = #tpu.core_type<tc>, window_params = [{pipeline_mode = #tpu.pipeline_mode<synchronous>, transform_indices = @transform_0, window_bounds = array<i64: 2, 32>}, {pipeline_mode = #tpu.pipeline_mode<synchronous>, transform_indices = @transform_1, window_bounds = array<i64: 32, 256>}, {pipeline_mode = #tpu.pipeline_mode<synchronous>, transform_indices = @transform_2, window_bounds = array<i64: 256, 256>}, {pipeline_mode = #tpu.pipeline_mode<synchronous>, transform_indices = @transform_3, window_bounds = array<i64: 256, 128>}, {pipeline_mode = #tpu.pipeline_mode<synchronous>, transform_indices = @transform_4, window_bounds = array<i64: 8, 256>}, {pipeline_mode = #tpu.pipeline_mode<synchronous>, transform_indices = @transform_5, window_bounds = array<i64: 2, 128>}]} {
    %c0 = arith.constant 0 : index
    %c0_0 = arith.constant 0 : index
    %0 = vector.load %arg1[%c0, %c0_0] : memref<2x32xf32, #tpu.memory_space<vmem>>, vector<2x32xf32>
    %1 = arith.truncf %0 : vector<2x32xf32> to vector<2x32xbf16>
    %c0_1 = arith.constant 0 : index
    %c0_2 = arith.constant 0 : index
    %2 = vector.load %arg5[%c0_1, %c0_2] : memref<8x256xf32, #tpu.memory_space<vmem>>, vector<1x256xf32>
    %c2 = arith.constant 2 : index
    %c0_3 = arith.constant 0 : index
    %3 = vector.load %arg5[%c2, %c0_3] : memref<8x256xf32, #tpu.memory_space<vmem>>, vector<1x128xf32>
    %c0_4 = arith.constant 0 : index
    %c0_5 = arith.constant 0 : index
    %4 = vector.load %arg2[%c0_4, %c0_5] : memref<32x256xbf16, #tpu.memory_space<vmem>>, vector<32x256xbf16>
    %cst = arith.constant dense<0.000000e+00> : vector<2x256xf32>
    %5 = tpu.matmul %1, %4, %cst {dimension_numbers = #tpu.dot_dimension_numbers<[1], [0], [0], [1], [0, 0, 1, 1], [], []>} : vector<2x32xbf16>, vector<32x256xbf16>, vector<2x256xf32> -> vector<2x256xf32>
    %6 = vector.broadcast %2 : vector<1x256xf32> to vector<2x256xf32>
    %7 = arith.addf %5, %6 : vector<2x256xf32>
    %cst_6 = arith.constant 0.000000e+00 : f32
    %8 = vector.broadcast %cst_6 : f32 to vector<2x256xf32>
    %9 = arith.maximumf %7, %8 : vector<2x256xf32>
    %10 = arith.truncf %9 : vector<2x256xf32> to vector<2x256xbf16>
    %c1 = arith.constant 1 : index
    %c0_7 = arith.constant 0 : index
    %11 = vector.load %arg5[%c1, %c0_7] : memref<8x256xf32, #tpu.memory_space<vmem>>, vector<1x256xf32>
    %c0_8 = arith.constant 0 : index
    %c0_9 = arith.constant 0 : index
    %12 = vector.load %arg3[%c0_8, %c0_9] : memref<256x256xbf16, #tpu.memory_space<vmem>>, vector<256x256xbf16>
    %cst_10 = arith.constant dense<0.000000e+00> : vector<2x256xf32>
    %13 = tpu.matmul %10, %12, %cst_10 {dimension_numbers = #tpu.dot_dimension_numbers<[1], [0], [0], [1], [0, 0, 1, 1], [], []>} : vector<2x256xbf16>, vector<256x256xbf16>, vector<2x256xf32> -> vector<2x256xf32>
    %14 = vector.broadcast %11 : vector<1x256xf32> to vector<2x256xf32>
    %15 = arith.addf %13, %14 : vector<2x256xf32>
    %cst_11 = arith.constant 0.000000e+00 : f32
    %16 = vector.broadcast %cst_11 : f32 to vector<2x256xf32>
    %17 = arith.maximumf %15, %16 : vector<2x256xf32>
    %18 = arith.truncf %17 : vector<2x256xf32> to vector<2x256xbf16>
    %c0_12 = arith.constant 0 : index
    %c0_13 = arith.constant 0 : index
    %19 = vector.load %arg4[%c0_12, %c0_13] : memref<256x128xbf16, #tpu.memory_space<vmem>>, vector<256x128xbf16>
    %cst_14 = arith.constant dense<0.000000e+00> : vector<2x128xf32>
    %20 = tpu.matmul %18, %19, %cst_14 {dimension_numbers = #tpu.dot_dimension_numbers<[1], [0], [0], [1], [0, 0, 1, 1], [], []>} : vector<2x256xbf16>, vector<256x128xbf16>, vector<2x128xf32> -> vector<2x128xf32>
    %21 = vector.broadcast %3 : vector<1x128xf32> to vector<2x128xf32>
    %22 = arith.addf %20, %21 : vector<2x128xf32>
    %23 = tpu.iota {dimensions = array<i32: 1>} : vector<2x128xi32>
    %c1_i32 = arith.constant 1 : i32
    %24 = vector.broadcast %c1_i32 : i32 to vector<2x128xi32>
    %25 = arith.cmpi sge, %23, %24 : vector<2x128xi32>
    %c4_i32 = arith.constant 4 : i32
    %26 = vector.broadcast %c4_i32 : i32 to vector<2x128xi32>
    %27 = arith.cmpi sle, %23, %26 : vector<2x128xi32>
    %28 = arith.andi %25, %27 : vector<2x128xi1>
    %cst_15 = arith.constant 0.000000e+00 : f32
    %29 = vector.broadcast %cst_15 : f32 to vector<2x128xf32>
    %30 = arith.select %28, %22, %29 : vector<2x128xi1>, vector<2x128xf32>
    %31 = vector.shape_cast %30 : vector<2x128xf32> to vector<1x2x128xf32>
    %cst_16 = arith.constant dense<0.000000e+00> : vector<1xf32>
    %32 = vector.multi_reduction <add>, %31, %cst_16 [1, 2] : vector<1x2x128xf32> to vector<1xf32>
    %33 = vector.shape_cast %32 : vector<1xf32> to vector<1x1x1xf32>
    %34 = vector.extract %33[0, 0, 0] : f32 from vector<1x1x1xf32>
    %cst_17 = arith.constant 1.250000e-01 : f32
    %35 = arith.mulf %34, %cst_17 : f32
    %36 = vector.extract_strided_slice %22 {offsets = [0, 0], sizes = [2, 1], strides = [1, 1]} : vector<2x128xf32> to vector<2x1xf32>
    %37 = vector.broadcast %36 : vector<2x1xf32> to vector<2x128xf32>
    %38 = arith.addf %22, %37 : vector<2x128xf32>
    %39 = vector.broadcast %35 : f32 to vector<2x128xf32>
    %40 = arith.subf %38, %39 : vector<2x128xf32>
    %41 = arith.truncf %40 : vector<2x128xf32> to vector<2x128xbf16>
    %c0_18 = arith.constant 0 : index
    %c0_19 = arith.constant 0 : index
    %42 = vector.load %arg6[%c0_18, %c0_19] : memref<2x128xbf16, #tpu.memory_space<vmem>>, vector<2x128xbf16>
    tpu.vector_store %arg6[%c0_18, %c0_19], %41 {strides = array<i32>} : memref<2x128xbf16, #tpu.memory_space<vmem>>, vector<2x128xbf16>,
    return
  }
  func.func @transform_0(%arg0: i32) -> (i32, i32) {
    %c0_i32 = arith.constant 0 : i32
    %c0_i32_0 = arith.constant 0 : i32
    %c0_i32_1 = arith.constant 0 : i32
    return %c0_i32, %c0_i32_0 : i32, i32
  }
  func.func @transform_1(%arg0: i32) -> (i32, i32) {
    %c0_i32 = arith.constant 0 : i32
    %c0_i32_0 = arith.constant 0 : i32
    %c0_i32_1 = arith.constant 0 : i32
    return %c0_i32, %c0_i32_0 : i32, i32
  }
  func.func @transform_2(%arg0: i32) -> (i32, i32) {
    %c0_i32 = arith.constant 0 : i32
    %c0_i32_0 = arith.constant 0 : i32
    %c0_i32_1 = arith.constant 0 : i32
    return %c0_i32, %c0_i32_0 : i32, i32
  }
  func.func @transform_3(%arg0: i32) -> (i32, i32) {
    %c0_i32 = arith.constant 0 : i32
    %c0_i32_0 = arith.constant 0 : i32
    %c0_i32_1 = arith.constant 0 : i32
    return %c0_i32, %c0_i32_0 : i32, i32
  }
  func.func @transform_4(%arg0: i32) -> (i32, i32) {
    %c0_i32 = arith.constant 0 : i32
    %c0_i32_0 = arith.constant 0 : i32
    %c0_i32_1 = arith.constant 0 : i32
    return %c0_i32, %c0_i32_0 : i32, i32
  }
  func.func @transform_5(%arg0: i32) -> (i32, i32) {
    %c0_i32 = arith.constant 0 : i32
    %c0_i32_0 = arith.constant 0 : i32
    %c0_i32_1 = arith.constant 0 : i32
    return %c0_i32, %c0_i32_0 : i32, i32
  }
}

</mosaic_0001>

<bundles_post_ra>
// kernel: tpu_custom_call.1
= control target key start
LH: loop header
LB: loop body
LE: loop exit
PB: predicated region body
PF: predicated region fallthrough
CT: control target
= control target key end

     0   :  { %10 = vsyncpa [#allocation3], 0  ;;  %s1108_s0 = inlined_call_operand.hbm [shape: f32[2,32], index: 0, kind: input, shape index: {}]   ;;  %s1109_s1 = inlined_call_operand.hbm [shape: bf16[32,256], index: 1, kind: input, shape index: {}]   ;;  %s1110_s2 = inlined_call_operand.hbm [shape: bf16[256,256], index: 2, kind: input, shape index: {}]   ;;  %s1111_s3 = inlined_call_operand.hbm [shape: bf16[256,128], index: 3, kind: input, shape index: {}]   ;;  %s1112_s4 = inlined_call_operand.hbm [shape: f32[8,256], index: 4, kind: input, shape index: {}]   ;;  %s1113_s5 = inlined_call_operand.hbm [shape: bf16[2,128], index: 5, kind: output, shape index: {}]  }
   0x1   :  { %11 = vsyncpa [#allocation6], 0 }
   0x2   :  { %12 = vsyncpa [#allocation9], 0  ;;  %s29_s20 = sshll.u32 %s1109_s1, 4  ;;  %s30_s20 = int_to_ptr.hbm [resolvable:$true] %s29_s20 }
   0x3   :  { %13 = vsyncpa [#allocation4], 0  ;;  %s1047_s21 = smov [#allocation5]   ;;  %s55_s25 = sshll.u32 %s1111_s3, 4  ;;  %s56_s25 = int_to_ptr.hbm [resolvable:$true] %s55_s25 }
   0x4   :  { %s31_s22 = sshll.u32 %s1047_s21, 4  ;;  %s1048_s26 = smov 128   ;;  %s32_s22 = int_to_ptr.vmem [resolvable:$true] %s31_s22 }
   0x5   :  { %s1049_s27 = smov 8   ;;  %s1050_s28 = smov [#allocation8]  }
   0x6   :  { %37 = dma.hbm_to_vmem [thread:$0]  %s30_s20, 512, %s32_s22, [#allocation6], %s1048_s26, %s1048_s26, %s1049_s27  }
   0x7   :  { %s57_s29 = sshll.u32 %s1050_s28, 4  ;;  %s1051_s30 = smov 64   ;;  %s58_s29 = int_to_ptr.vmem [resolvable:$true] %s57_s29 }
   0x8   :  { %s1052_s6 = smov 4   ;;  %s19_s8 = sshll.u32 %s1108_s0, 4  ;;  %s20_s8 = int_to_ptr.hbm [resolvable:$true] %s19_s8 }
   0x9   :  { %63 = dma.hbm_to_vmem [thread:$0]  %s56_s25, 2048, %s58_s29, [#allocation9], %s1051_s30, %s1051_s30, %s1052_s6  }
   0xa   :  { %s1053_s9 = smov [#allocation2]   ;;  %s42_s12 = sshll.u32 %s1110_s2, 4  ;;  %s43_s12 = int_to_ptr.hbm [resolvable:$true] %s42_s12 }
   0xb   :  { %s21_s10 = sshll.u32 %s1053_s9, 4  ;;  %s1054_s13 = smov [#allocation7]   ;;  %s22_s10 = int_to_ptr.vmem [resolvable:$true] %s21_s10 }
   0xc   :  { %24 = dma.hbm_to_vmem [thread:$0]  %s20_s8, 32, %s22_s10, [#allocation3]  }
   0xd   :  { %s44_s14 = sshll.u32 %s1054_s13, 4  ;;  %s69_s17 = sshll.u32 %s1112_s4, 4  ;;  %s45_s14 = int_to_ptr.vmem [resolvable:$true] %s44_s14  ;;  %s70_s17 = int_to_ptr.hbm [resolvable:$true] %s69_s17 }
   0xe   :  { %50 = dma.hbm_to_vmem [thread:$0]  %s43_s12, 4096, %s45_s14, [#allocation6], %s1048_s26, %s1048_s26, %s1049_s27  }
   0xf   :  { %s1055_s0 = smov [#allocation10]  }
  0x10   :  { %s71_s18 = sshll.u32 %s1055_s0, 4  ;;  %s72_s18 = int_to_ptr.vmem [resolvable:$true] %s71_s18 }
  0x11   :  { %74 = dma.hbm_to_vmem [thread:$0]  %s70_s17, 256, %s72_s18, [#allocation9]  }
  0x12   :  { %1039 = dma.done.wait [#allocation3], 32  }
  0x13   :  { %1040 = vsyncadd [#allocation3], 4294967264 }
  0x14   :  { %1041 = dma.done.wait [#allocation6], 4608  }
  0x15   :  { %1042 = vsyncadd [#allocation6], 4294962688 }
  0x16   :  { %1043 = dma.done.wait [#allocation9], 2304  }
  0x17   :  { %1044 = vsyncadd [#allocation9], 4294964992  ;;  %vm129_vm0 = vcmask 261120   ;;  %v629_v0 = vld [vmem:[#allocation5 + $0x10] sm:$0xf]  ;;  %vm578_vm4 = vcmask 1041408  }
  0x18   :  { %v832_v1 = vld [vmem:[#allocation5 + $0x14] sm:$0xf0]  ;;  %v831_v2 = vld [vmem:[#allocation5 + $0x14] sm:$0xf]  ;;  %v631_v4 = vld [vmem:[#allocation5 + $0x18] sm:$0xf0] }
  0x19   :  { %v630_v3 = vor.u32 %v832_v1, %v629_v0  ;;  %v621_v5 = vld [vmem:[#allocation5] sm:$0xf]  ;;  %v830_v6 = vld [vmem:[#allocation5 + $0x4] sm:$0xf0]  ;;  %v634_v7 = vor.u32 %v831_v2, %v631_v4  ;;  %v829_v8 = vld [vmem:[#allocation5 + $0x4] sm:$0xf] }
  0x1a   :  { %v623_v9 = vld [vmem:[#allocation5 + $0x8] sm:$0xf0]  ;;  %v96_v10 = vld [vmem:[#allocation2] sm:$0x3]  ;;  %v622_v11 = vor.u32 %v830_v6, %v621_v5  ;;  %v695_v12 = vld [vmem:[#allocation7 + $0x70] sm:$0xf] }
  0x1b   :  { %139 = vmatpush.bf16.msra.mxu0 %v630_v3  ;;  %v848_v13 = vld [vmem:[#allocation7 + $0x74] sm:$0xf0]  ;;  %v759_v14 = vld [vmem:[#allocation7 + $0xf0] sm:$0xf]  ;;  %152 = vmatpush.bf16.msra.mxu1 %v634_v7  ;;  %v626_v15 = vor.u32 %v829_v8, %v623_v9  ;;  %v847_v18 = vld [vmem:[#allocation7 + $0x74] sm:$0xf]  ;;  %v97_v25 = vpack.c.bf16 %v96_v10, %v96_v10 }
  0x1c   :  { %v696_v16 = vor.u32 %v848_v13, %v695_v12  ;;  %v864_v17 = vld [vmem:[#allocation7 + $0xf4] sm:$0xf0]  ;;  %v697_v19 = vld [vmem:[#allocation7 + $0x78] sm:$0xf0]  ;;  %v863_v22 = vld [vmem:[#allocation7 + $0xf4] sm:$0xf] }
  0x1d   :  { %v760_v20 = vor.u32 %v864_v17, %v759_v14  ;;  %v700_v21 = vor.u32 %v847_v18, %v697_v19  ;;  %v761_v23 = vld [vmem:[#allocation7 + $0xf8] sm:$0xf0]  ;;  %v687_v24 = vld [vmem:[#allocation7 + $0x60] sm:$0xf]  ;;  %v846_v27 = vld [vmem:[#allocation7 + $0x64] sm:$0xf0] }
  0x1e   :  { %362 = vmatpush.bf16.msra.mxu2 %v696_v16  ;;  %v764_v26 = vor.u32 %v863_v22, %v761_v23  ;;  %v751_v28 = vld [vmem:[#allocation7 + $0xe0] sm:$0xf]  ;;  %v862_v29 = vld [vmem:[#allocation7 + $0xe4] sm:$0xf0]  ;;  %v688_v30 = vor.u32 %v846_v27, %v687_v24  ;;  %v845_v32 = vld [vmem:[#allocation7 + $0x64] sm:$0xf] }
  0x1f   :  { %140 = vmatpush.bf16.msra.mxu0 %v622_v11  ;;  %375 = vmatpush.bf16.msra.mxu3 %v760_v20  ;;  %v752_v31 = vor.u32 %v862_v29, %v751_v28  ;;  %v689_v33 = vld [vmem:[#allocation7 + $0x68] sm:$0xf0]  ;;  %v861_v34 = vld [vmem:[#allocation7 + $0xe4] sm:$0xf]  ;;  %v679_v37 = vld [vmem:[#allocation7 + $0x50] sm:$0xf] }
  0x20   :  { %153 = vmatpush.bf16.msra.mxu1 %v626_v15  ;;  %v692_v35 = vor.u32 %v845_v32, %v689_v33  ;;  %v753_v36 = vld [vmem:[#allocation7 + $0xe8] sm:$0xf0]  ;;  %v844_v38 = vld [vmem:[#allocation7 + $0x54] sm:$0xf0]  ;;  %v743_v40 = vld [vmem:[#allocation7 + $0xd0] sm:$0xf] }
  0x21   :  { %v756_v39 = vor.u32 %v861_v34, %v753_v36  ;;  %v860_v41 = vld [vmem:[#allocation7 + $0xd4] sm:$0xf0]  ;;  %v843_v42 = vld [vmem:[#allocation7 + $0x54] sm:$0xf]  ;;  %v680_v43 = vor.u32 %v844_v38, %v679_v37  ;;  %v681_v44 = vld [vmem:[#allocation7 + $0x58] sm:$0xf0] }
  0x22   :  { %635 = vmatmul.msk.bf16.vlgmr.msra.gmra.mxu0 %vm129_vm0, %v97_v25  ;;  %363 = vmatpush.bf16.msra.mxu2 %v688_v30  ;;  %v859_v45 = vld [vmem:[#allocation7 + $0xd4] sm:$0xf]  ;;  %v745_v46 = vld [vmem:[#allocation7 + $0xd8] sm:$0xf0]  ;;  %v744_v47 = vor.u32 %v860_v41, %v743_v40  ;;  %v671_v48 = vld [vmem:[#allocation7 + $0x40] sm:$0xf]  ;;  %v684_v50 = vor.u32 %v843_v42, %v681_v44 }
  0x23   :  { %388 = vmatpush.bf16.msrb.mxu0 %v700_v21  ;;  %636 = vmatmul.msk.bf16.vlgmr.msra.gmra.mxu1 %vm129_vm0, %v97_v25  ;;  %v842_v49 = vld [vmem:[#allocation7 + $0x44] sm:$0xf0]  ;;  %v735_v51 = vld [vmem:[#allocation7 + $0xc0] sm:$0xf]  ;;  %v748_v53 = vor.u32 %v859_v45, %v745_v46  ;;  %v841_v54 = vld [vmem:[#allocation7 + $0x44] sm:$0xf] }
  0x24   :  { %401 = vmatpush.bf16.msrb.mxu1 %v764_v26  ;;  %376 = vmatpush.bf16.msra.mxu3 %v752_v31  ;;  %v858_v52 = vld [vmem:[#allocation7 + $0xc4] sm:$0xf0]  ;;  %v673_v55 = vld [vmem:[#allocation7 + $0x48] sm:$0xf0]  ;;  %v672_v56 = vor.u32 %v842_v49, %v671_v48  ;;  %v857_v57 = vld [vmem:[#allocation7 + $0xc4] sm:$0xf] }
  0x25   :  { %v737_v58 = vld [vmem:[#allocation7 + $0xc8] sm:$0xf0]  ;;  %v736_v59 = vor.u32 %v858_v52, %v735_v51  ;;  %v663_v60 = vld [vmem:[#allocation7 + $0x30] sm:$0xf]  ;;  %v840_v61 = vld [vmem:[#allocation7 + $0x34] sm:$0xf0]  ;;  %v676_v62 = vor.u32 %v841_v54, %v673_v55 }
  0x26   :  { %364 = vmatpush.bf16.msra.mxu2 %v680_v43  ;;  %v727_v63 = vld [vmem:[#allocation7 + $0xb0] sm:$0xf]  ;;  %v856_v0 = vld [vmem:[#allocation7 + $0xb4] sm:$0xf0]  ;;  %v740_v1 = vor.u32 %v857_v57, %v737_v58  ;;  %v839_v2 = vld [vmem:[#allocation7 + $0x34] sm:$0xf]  ;;  %v664_v4 = vor.u32 %v840_v61, %v663_v60 }
  0x27   :  { %389 = vmatpush.bf16.msrb.mxu0 %v692_v35  ;;  %v665_v3 = vld [vmem:[#allocation7 + $0x38] sm:$0xf0]  ;;  %v855_v5 = vld [vmem:[#allocation7 + $0xb4] sm:$0xf]  ;;  %v728_v7 = vor.u32 %v856_v0, %v727_v63  ;;  %v655_v8 = vld [vmem:[#allocation7 + $0x20] sm:$0xf] }
  0x28   :  { %402 = vmatpush.bf16.msrb.mxu1 %v756_v39  ;;  %377 = vmatpush.bf16.msra.mxu3 %v744_v47  ;;  %v729_v6 = vld [vmem:[#allocation7 + $0xb8] sm:$0xf0]  ;;  %v838_v9 = vld [vmem:[#allocation7 + $0x24] sm:$0xf0]  ;;  %v668_v10 = vor.u32 %v839_v2, %v665_v3  ;;  %v719_v11 = vld [vmem:[#allocation7 + $0xa0] sm:$0xf] }
  0x29   :  { %v854_v12 = vld [vmem:[#allocation7 + $0xa4] sm:$0xf0]  ;;  %v732_v13 = vor.u32 %v855_v5, %v729_v6  ;;  %v837_v14 = vld [vmem:[#allocation7 + $0x24] sm:$0xf]  ;;  %v657_v15 = vld [vmem:[#allocation7 + $0x28] sm:$0xf0]  ;;  %v656_v16 = vor.u32 %v838_v9, %v655_v8 }
  0x2a   :  { %365 = vmatpush.bf16.msra.mxu2 %v672_v56  ;;  %v853_v17 = vld [vmem:[#allocation7 + $0xa4] sm:$0xf]  ;;  %v721_v18 = vld [vmem:[#allocation7 + $0xa8] sm:$0xf0]  ;;  %v720_v19 = vor.u32 %v854_v12, %v719_v11  ;;  %v660_v20 = vor.u32 %v837_v14, %v657_v15  ;;  %v647_v22 = vld [vmem:[#allocation7 + $0x10] sm:$0xf] }
  0x2b   :  { %390 = vmatpush.bf16.msrb.mxu0 %v684_v50  ;;  %v724_v21 = vor.u32 %v853_v17, %v721_v18  ;;  %v836_v23 = vld [vmem:[#allocation7 + $0x14] sm:$0xf0]  ;;  %v711_v24 = vld [vmem:[#allocation7 + $0x90] sm:$0xf]  ;;  %v835_v27 = vld [vmem:[#allocation7 + $0x14] sm:$0xf] }
  0x2c   :  { %403 = vmatpush.bf16.msrb.mxu1 %v748_v53  ;;  %378 = vmatpush.bf16.msra.mxu3 %v736_v59  ;;  %v648_v25 = vor.u32 %v836_v23, %v647_v22  ;;  %v852_v26 = vld [vmem:[#allocation7 + $0x94] sm:$0xf0]  ;;  %v649_v28 = vld [vmem:[#allocation7 + $0x18] sm:$0xf0]  ;;  %v851_v31 = vld [vmem:[#allocation7 + $0x94] sm:$0xf] }
  0x2d   :  { %v712_v29 = vor.u32 %v852_v26, %v711_v24  ;;  %v652_v30 = vor.u32 %v835_v27, %v649_v28  ;;  %v713_v32 = vld [vmem:[#allocation7 + $0x98] sm:$0xf0]  ;;  %v639_v34 = vld [vmem:[#allocation7] sm:$0xf]  ;;  %v834_v35 = vld [vmem:[#allocation7 + $0x4] sm:$0xf0] }
  0x2e   :  { %366 = vmatpush.bf16.msra.mxu2 %v664_v4  ;;  %v716_v33 = vor.u32 %v851_v31, %v713_v32  ;;  %v703_v36 = vld [vmem:[#allocation7 + $0x80] sm:$0xf]  ;;  %v640_v37 = vor.u32 %v834_v35, %v639_v34  ;;  %v850_v38 = vld [vmem:[#allocation7 + $0x84] sm:$0xf0]  ;;  %v833_v39 = vld [vmem:[#allocation7 + $0x4] sm:$0xf]  ;;  %v572_v31 = vlaneseq }
  0x2f   :  { %391 = vmatpush.bf16.msrb.mxu0 %v676_v62  ;;  %v641_v40 = vld [vmem:[#allocation7 + $0x8] sm:$0xf0]  ;;  %v704_v41 = vor.u32 %v850_v38, %v703_v36  ;;  %v849_v43 = vld [vmem:[#allocation7 + $0x84] sm:$0xf]  ;;  %v880_v46 = vld [vmem:[#allocation8 + $0x78] sm:$0xff]  ;;  %s1057_s19 = smov [#allocation11]  }
  0x30   :  { %404 = vmatpush.bf16.msrb.mxu1 %v740_v1  ;;  %379 = vmatpush.bf16.msra.mxu3 %v728_v7  ;;  %v644_v42 = vor.u32 %v833_v39, %v641_v40  ;;  %v705_v44 = vld [vmem:[#allocation7 + $0x88] sm:$0xf0]  ;;  %v872_v47 = vld [vmem:[#allocation8 + $0x38] sm:$0xff]  ;;  %v879_v48 = vld [vmem:[#allocation8 + $0x70] sm:$0xff]  ;;  %s605_s20 = sshll.u32 %s1057_s19, 4  ;;  %s607_s23 = sshll.u32 %s1113_s5, 4  ;;  %s606_s20 = int_to_ptr.vmem [resolvable:$true] %s605_s20  ;;  %s608_s23 = int_to_ptr.hbm [resolvable:$true] %s607_s23 }
  0x31   :  { %v708_v45 = vor.u32 %v849_v43, %v705_v44  ;;  %v871_v49 = vld [vmem:[#allocation8 + $0x30] sm:$0xff]  ;;  %v878_v50 = vld [vmem:[#allocation8 + $0x68] sm:$0xff]  ;;  %v877_v52 = vld [vmem:[#allocation8 + $0x60] sm:$0xff] }
  0x32   :  { %367 = vmatpush.bf16.msra.mxu2 %v656_v16  ;;  %v870_v51 = vld [vmem:[#allocation8 + $0x28] sm:$0xff]  ;;  %v869_v53 = vld [vmem:[#allocation8 + $0x20] sm:$0xff]  ;;  %v876_v54 = vld [vmem:[#allocation8 + $0x58] sm:$0xff] }
  0x33   :  { %392 = vmatpush.bf16.msrb.mxu0 %v668_v10  ;;  %v98_v55 = vld [vmem:[#allocation10] ss:$8 sm:$0x3]  ;;  %v875_v56 = vld [vmem:[#allocation8 + $0x50] sm:$0xff]  ;;  %v868_v5 = vld [vmem:[#allocation8 + $0x18] sm:$0xff] }
  0x34   :  { %405 = vmatpush.bf16.msrb.mxu1 %v732_v13  ;;  %380 = vmatpush.bf16.msra.mxu3 %v720_v19  ;;  %v105_v57 = vperm.slane %v98_v55, 0  ;;  %v106_v58 = vperm.slane %v98_v55, 1  ;;  %v874_v6 = vld [vmem:[#allocation8 + $0x48] sm:$0xff]  ;;  %v867_v7 = vld [vmem:[#allocation8 + $0x10] sm:$0xff]  ;;  %v873_v8 = vld [vmem:[#allocation8 + $0x40] sm:$0xff] }
  0x35   :  { %v866_v9 = vld [vmem:[#allocation8 + $0x8] sm:$0xff]  ;;  %v865_v10 = vld [vmem:[#allocation8] sm:$0xff] }
  0x36   :  { %368 = vmatpush.bf16.msra.mxu2 %v648_v25  ;;  %v164_v11 = vld [vmem:[#allocation10 + $0x1] ss:$8 sm:$0x3]  ;;  %v99_v34 = vld [vmem:[#allocation10 + $0x2] ss:$0 sm:$0xff] }
  0x37   :  { %393 = vmatpush.bf16.msrb.mxu0 %v660_v20  ;;  %v199_v12 = vperm.slane %v164_v11, 1  ;;  %v198_v17 = vperm.slane %v164_v11, 0 }
  0x38   :  { %406 = vmatpush.bf16.msrb.mxu1 %v724_v21  ;;  %381 = vmatpush.bf16.msra.mxu3 %v712_v29 }
  0x3a   :  { %369 = vmatpush.bf16.msra.mxu2 %v640_v37 }
  0x3b   :  { %394 = vmatpush.bf16.msrb.mxu0 %v652_v30  ;;  %v1056_v30 = vmov 0  }
  0x3c   :  { %407 = vmatpush.bf16.msrb.mxu1 %v716_v33  ;;  %382 = vmatpush.bf16.msra.mxu3 %v704_v41  ;;  %v573_v33 = vand.u32 127, %v572_v31 }
  0x3d   :  { %894 = vset.pattern.permute.xlu0 %v1056_v30 }
  0x3e   :  { %546 = vmatpush.bf16.msrb.mxu2 %v872_v47  ;;  %vm574_vm1 = vcmp.ge.s32.totalorder %v573_v33, 1  ;;  %vm575_vm2 = vcmp.le.s32.totalorder %v573_v33, 4 }
  0x3f   :  { %395 = vmatpush.bf16.msrb.mxu0 %v644_v42  ;;  %vm576_vm3 = vmand %vm574_vm1, %vm575_vm2 }
  0x40   :  { %408 = vmatpush.bf16.msrb.mxu1 %v708_v45  ;;  %559 = vmatpush.bf16.msrb.mxu3 %v880_v46 }
  0x42   :  { %547 = vmatpush.bf16.msrb.mxu2 %v871_v49 }
  0x44   :  { %560 = vmatpush.bf16.msrb.mxu3 %v879_v48 }
  0x46   :  { %548 = vmatpush.bf16.msrb.mxu2 %v870_v51 }
  0x48   :  { %561 = vmatpush.bf16.msrb.mxu3 %v878_v50 }
  0x4a   :  { %549 = vmatpush.bf16.msrb.mxu2 %v869_v53 }
  0x4c   :  { %562 = vmatpush.bf16.msrb.mxu3 %v877_v52 }
  0x4e   :  { %550 = vmatpush.bf16.msrb.mxu2 %v868_v5 }
  0x50   :  { %563 = vmatpush.bf16.msrb.mxu3 %v876_v54 }
  0x52   :  { %551 = vmatpush.bf16.msrb.mxu2 %v867_v7 }
  0x54   :  { %564 = vmatpush.bf16.msrb.mxu3 %v875_v56 }
  0x56   :  { %552 = vmatpush.bf16.msrb.mxu2 %v866_v9 }
  0x58   :  { %565 = vmatpush.bf16.msrb.mxu3 %v874_v6 }
  0x5a   :  { %553 = vmatpush.bf16.msrb.mxu2 %v865_v10 }
  0x5c   :  { %566 = vmatpush.bf16.msrb.mxu3 %v873_v8 }
  0x9f   :  { %v142_v59 = vpop.f32.mrf.mxu0 }
  0xa0   :  { %v143_v60 = vadd.f32 %v142_v59, %v105_v57  ;;  %v155_v61 = vpop.f32.mrf.mxu1 }
  0xa1   :  { %v156_v62 = vadd.f32 %v155_v61, %v106_v58 }
  0xa2   :  { %v159_v63 = vmax.f32 %v143_v60, 0.0 }
  0xa3   :  { %v160_v0 = vmax.f32 %v156_v62, 0.0 }
  0xa4   :  { %v161_v1 = vpack.c.bf16 %v159_v63, %v159_v63 }
  0xa5   :  { %v162_v2 = vpack.c.bf16 %v160_v0, %v160_v0 }
  0xa6   :  { %370 = vmatmul.bf16.vlgmr.msra.gmra.mxu2 %v161_v1  ;;  %396 = vmatmul.bf16.vlgmr.msrb.gmra.mxu0 %v161_v1 }
  0xa7   :  { %383 = vmatmul.bf16.vlgmr.msra.gmra.mxu3 %v162_v2  ;;  %409 = vmatmul.bf16.vlgmr.msrb.gmra.mxu1 %v162_v2  ;;  %v144_v3 = vpop.f32.mrf.mxu0 }
  0xa8   :  { %v157_v4 = vpop.f32.mrf.mxu1 }
 0x123   :  { %v397_v13 = vpop.f32.mrf.mxu0 }
 0x124   :  { %v398_v14 = vadd.f32 %v397_v13, %v199_v12  ;;  %v410_v15 = vpop.f32.mrf.mxu1 }
 0x126   :  { %v411_v16 = vadd.f32 %v410_v15, %v398_v14 }
 0x128   :  { %v415_v18 = vmax.f32 %v411_v16, 0.0 }
 0x129   :  { %v371_v19 = vpop.f32.mrf.mxu2 }
 0x12a   :  { %v417_v20 = vpack.c.bf16 %v415_v18, %v415_v18  ;;  %v372_v21 = vadd.f32 %v371_v19, %v198_v17  ;;  %v384_v22 = vpop.f32.mrf.mxu3 }
 0x12b   :  { %v399_v23 = vpop.f32.mrf.mxu0 }
 0x12c   :  { %v385_v24 = vadd.f32 %v384_v22, %v372_v21  ;;  %v412_v25 = vpop.f32.mrf.mxu1  ;;  %567 = vmatmul.bf16.vlgmr.msrb.gmra.mxu3 %v417_v20 }
 0x12e   :  { %v414_v26 = vmax.f32 %v385_v24, 0.0 }
 0x130   :  { %v416_v27 = vpack.c.bf16 %v414_v26, %v414_v26 }
 0x131   :  { %v373_v28 = vpop.f32.mrf.mxu2 }
 0x132   :  { %v386_v29 = vpop.f32.mrf.mxu3  ;;  %554 = vmatmul.bf16.vlgmr.msrb.gmra.mxu2 %v416_v27 }
 0x1af   :  { %v568_v32 = vpop.f32.mrf.mxu3 }
 0x1b5   :  { %v555_v35 = vpop.f32.mrf.mxu2 }
 0x1b6   :  { %v556_v36 = vadd.f32 %v555_v35, %v99_v34 }
 0x1b7   :  { %v570_v37 = vpop.f32.mrf.mxu3 }
 0x1b8   :  { %v569_v38 = vadd.f32 %v568_v32, %v556_v36 }
 0x1ba   :  { %v577_v39 = vsel %vm576_vm3, %v569_v38, 0.0 }
 0x1bb   :  { %v579_v40 = vsel %vm578_vm4, %v577_v39, 0.0 }
 0x1bc   :  { %580 = vadd.xlane.f32.xlu0 %v579_v40 }
 0x1bd   :  { %v557_v41 = vpop.f32.mrf.mxu2 }
 0x1d0   :  { %592 = vperm.xlu0 %894, %v569_v38  }
 0x22f   :  { %v581_v42 = vpop.xlane.xlu0 %580 }
 0x230   :  { %v582_v43 = vrot.slane %v581_v42, 4 }
 0x232   :  { %v583_v44 = vadd.f32 %v582_v43, %v581_v42 }
 0x234   :  { %v584_v45 = vrot.slane %v583_v44, 2 }
 0x236   :  { %v585_v46 = vadd.f32 %v584_v45, %v583_v44 }
 0x238   :  { %v586_v47 = vrot.slane %v585_v46, 1 }
 0x23a   :  { %v587_v48 = vadd.f32 %v586_v47, %v585_v46 }
 0x23c   :  { %881 = vpush %v587_v48 }
 0x242   :  { %v593_v49 = vpop.permute.xlu0 %592 }
 0x243   :  { %v595_v50 = vadd.f32 %v593_v49, %v569_v38 }
 0x26d   :  { %s882_s2 = spop %881 }
 0x26e   :  { %s589_s4 = smul.f32 0.125, %s882_s2 }
 0x270   :  { %v596_v51 = vstv %s589_s4 }
 0x271   :  { %v597_v52 = vsub.f32 %v595_v50, %v596_v51 }
 0x273   :  { %v598_v53 = vpack.c.bf16 %v597_v52, %v597_v52 }
 0x275   :  { %599 = vst [vmem:[#allocation11] sm:$0x1] %v598_v53 }
 0x276   :  { %610 = dma.vmem_to_hbm [thread:$0]  %s606_s20, 16, %s608_s23, [#allocation4]  }
 0x277   :  { %1045 = dma.done.wait [#allocation4], 16  }
 0x278   :  { %1046 = vsyncadd [#allocation4], 4294967280 }
 0x279   :  { %615 = vsyncpa [#allocation3], 1 }
 0x27a   :  { %616 = vsyncpa [#allocation6], 1 }
 0x27b   :  { %617 = vsyncpa [#allocation9], 1 }
 0x27c   :  { %618 = vsyncpa [#allocation4], 1 }

</bundles_post_ra>
